<compile_context>
chip_gen: v5e
topology: v5e:2x2
jax: 0.10.0
libtpu: 0.0.40
codegen_flags: <defaults>
</compile_context>

<pallas_src>
import functools

import numpy as np
import jax
import jax.numpy as jnp
from jax.experimental import pallas as pl
from jax.experimental.pallas import tpu as pltpu


def _round_up(x, m):
    return (x + m - 1) // m * m


def _vmem_bytes(shape, dtype):
    """Rough VMEM footprint of a 2-D block, accounting for (8, 128) tile padding."""
    r, c = shape
    return _round_up(r, 8) * _round_up(c, 128) * np.dtype(dtype).itemsize


# ----------------------------------------------------------------------------
# Fused kernel: one token tile x one vocab chunk per grid step.
# ----------------------------------------------------------------------------
def _map_embedding_kernel(idx_ref, map_ref, l1_ref, out_ref, logits_acc):
    # idx_ref    : (T, 1)    int32   token indices for this tile
    # map_ref    : (TV2, V1) mxu_dt  chunk of map_weights rows (streamed over grid axis 1)
    # l1_ref     : (V1, D)   mxu_dt  full l1 table (constant index_map -> never re-fetched)
    # out_ref    : (T, D)    out_dt  embeddings, natural layout (no wrapper transpose)
    # logits_acc : (T, V1)   f32     VMEM scratch accumulating gathered logits over chunks
    c = pl.program_id(1)
    T = idx_ref.shape[0]
    TV2 = map_ref.shape[0]

    @pl.when(c == 0)
    def _init():
        logits_acc[...] = jnp.zeros_like(logits_acc)

    # One-hot "gather" of map rows on the MXU, restricted to this vocab chunk:
    #   logits[t, :] += map_weights[idx[t], :]   iff idx[t] in [c*TV2, (c+1)*TV2)
    idx = idx_ref[...]                                                    # (T, 1)
    v_iota = jax.lax.broadcasted_iota(jnp.int32, (T, TV2), 1) + c * TV2   # vocab ids
    oh = (v_iota == idx).astype(map_ref.dtype)                            # (T, TV2) exact 0/1
    logits_acc[...] += jnp.dot(oh, map_ref[...],
                               preferred_element_type=jnp.float32)        # (T, V1) f32

    @pl.when(c == pl.num_programs(1) - 1)
    def _finalize():
        logits = logits_acc[...]                                          # (T, V1) f32
        m = jnp.max(logits, axis=1, keepdims=True)
        e = jnp.exp(logits - m)
        denom = jnp.sum(e, axis=1, keepdims=True)
        probs = e / denom    # exact normalisation (approx reciprocal was too lossy)
        # NOTE: for V1 <= 16 an unrolled VPU broadcast-FMA combine could replace this
        # K=V1 underfilled MXU pass; kept as jnp.dot for simplicity.
        out = jnp.dot(probs.astype(l1_ref.dtype), l1_ref[...],
                      preferred_element_type=jnp.float32)                 # (T, D)
        out_ref[...] = out.astype(out_ref.dtype)


# ----------------------------------------------------------------------------
# MapEmbedding.forward equivalent.
# ----------------------------------------------------------------------------
# TODO(synk): map_weights is trainable in the PyTorch module; only the forward pass is
# implemented here (jax.grad through this pallas_call needs a custom_vjp / backward kernel).
def map_embedding_forward(x, map_weights, l1_weights, *,
                          block_tokens=512, v2_chunk=2048,
                          mxu_dtype=jnp.bfloat16, out_dtype=None,
                          vmem_budget_bytes=48 * 1024 * 1024):
    if x.ndim not in (1, 2):
        raise ValueError("x must be a 1-D or 2-D index tensor")
    V2, V1 = map_weights.shape
    V1b, D = l1_weights.shape
    assert V1 == V1b, "map_weights / l1_weights inner dims must match"
    if out_dtype is None:
        out_dtype = l1_weights.dtype

    flat = x.reshape(-1).astype(jnp.int32)
    N = flat.shape[0]

    # Token tile (sublane axis of the (T, D) output block) and streamed vocab chunk.
    T = _round_up(min(block_tokens, N), 8)
    tv2 = _round_up(min(v2_chunk, V2), 8)

    # Keep the per-step VMEM footprint under budget (matters on v7x's 64 MiB VMEM):
    # double-buffered blocks + f32 scratch + live one-hot.
    def vmem_estimate(t, tv):
        return (2 * _vmem_bytes((t, 1), jnp.int32)
                + 2 * _vmem_bytes((tv, V1), mxu_dtype)
                + 2 * _vmem_bytes((V1, D), mxu_dtype)
                + 2 * _vmem_bytes((t, D), out_dtype)
                + _vmem_bytes((t, V1), jnp.float32)
                + _vmem_bytes((t, tv), mxu_dtype))
    while vmem_estimate(T, tv2) > vmem_budget_bytes and T > 128:
        T = _round_up(T // 2, 8)
    while vmem_estimate(T, tv2) > vmem_budget_bytes and tv2 > 128:
        tv2 = _round_up(tv2 // 2, 8)

    N_pad = _round_up(N, T)
    G = N_pad // T
    V2_pad = _round_up(V2, tv2)
    C = V2_pad // tv2

    # Padding: extra tokens look up row 0 (valid, discarded afterwards); extra vocab rows
    # are zero and never selected by the one-hot since every real index is < V2.
    # NOTE: out-of-range indices (>= V2) would silently yield a uniform-softmax mix,
    # unlike PyTorch's bounds check.
    idx2d = jnp.pad(flat, (0, N_pad - N)).reshape(N_pad, 1)
    map_p = jnp.pad(map_weights, ((0, V2_pad - V2), (0, 0))).astype(mxu_dtype)
    l1_p = l1_weights.astype(mxu_dtype)

    compiler_kwargs = dict(dimension_semantics=("parallel", "arbitrary"))
    est = vmem_estimate(T, tv2)
    if est > 32 * 1024 * 1024:
        compiler_kwargs["vmem_limit_bytes"] = int(min(vmem_budget_bytes, est + (8 << 20)))

    out = pl.pallas_call(
        _map_embedding_kernel,
        out_shape=jax.ShapeDtypeStruct((N_pad, D), out_dtype),
        grid=(G, C),
        in_specs=[
            # l1's index_map is constant, so Pallas never re-fetches it between steps
            # (pl.Buffered(1) would additionally drop its second buffer; minor, omitted).
            pl.BlockSpec((T, 1), lambda g, c: (g, 0)),        # indices for this token tile
            pl.BlockSpec((tv2, V1), lambda g, c: (c, 0)),     # streamed map_weights chunk
            pl.BlockSpec((V1, D), lambda g, c: (0, 0)),       # resident l1_weights
        ],
        out_specs=pl.BlockSpec((T, D), lambda g, c: (g, 0)),  # natural (tokens, D) layout
        scratch_shapes=[pltpu.VMEM((T, V1), jnp.float32)],
        compiler_params=pltpu.CompilerParams(**compiler_kwargs),
    )(idx2d, map_p, l1_p)

    emb = out[:N]                                             # no transpose needed
    if x.ndim == 2:
        B, S = x.shape
        return emb.reshape(B, S, D)
    return emb


# Pure-JAX reference for correctness checking.
def map_embedding_ref(x, map_weights, l1_weights):
    l2 = jax.nn.softmax(map_weights.astype(jnp.float32), axis=1) @ l1_weights.astype(jnp.float32)
    return l2[x]


if __name__ == "__main__":
    key = jax.random.PRNGKey(0)

    # ---- Test A: exact f32 path, module-consistent small shapes -------------------
    #   V1 = 8 base embeddings, D = 32 embedding dim, V2 = 16 mapped vocab, batch 2, seq 8.
    V1, D, V2 = 8, 32, 16
    B, S = 2, 8
    k1, k2, k3 = jax.random.split(key, 3)
    l1_weights = jax.random.normal(k1, (V1, D), dtype=jnp.float32)     # frozen table
    map_weights = jax.random.normal(k2, (V2, V1), dtype=jnp.float32)   # trainable logits
    x = jax.random.randint(k3, (B, S), 0, V2, dtype=jnp.int32)

    fwd_f32 = jax.jit(functools.partial(map_embedding_forward,
                                        mxu_dtype=jnp.float32, out_dtype=jnp.float32))
    out = jax.block_until_ready(fwd_f32(x, map_weights, l1_weights))
    ref = map_embedding_ref(x, map_weights, l1_weights)
    assert out.shape == (B, S, D)
    assert jnp.allclose(out, ref, atol=1e-3, rtol=1e-3), "f32 path mismatch (2-D x)"

    out1d = jax.block_until_ready(fwd_f32(x[0], map_weights, l1_weights))
    assert out1d.shape == (S, D)
    assert jnp.allclose(out1d, ref[0], atol=1e-3, rtol=1e-3), "f32 path mismatch (1-D x)"

    # ---- Test B: bf16 MXU operands, multi-tile / multi-chunk grid, bf16 output ----
    #   V2 = 300 with v2_chunk = 128 exercises vocab padding + 3-chunk accumulation;
    #   400 tokens with block_tokens = 128 gives 4 token tiles (even G for v7x cores).
    V1b_, Db_, V2b_ = 16, 128, 300
    Bb_, Sb_ = 2, 200
    k4, k5, k6 = jax.random.split(k3, 3)
    l1_b = jax.random.normal(k4, (V1b_, Db_), dtype=jnp.float32)
    map_b = jax.random.normal(k5, (V2b_, V1b_), dtype=jnp.float32)
    x_b = jax.random.randint(k6, (Bb_, Sb_), 0, V2b_, dtype=jnp.int32)

    fwd_bf16 = jax.jit(functools.partial(map_embedding_forward,
                                         block_tokens=128, v2_chunk=128,
                                         mxu_dtype=jnp.bfloat16, out_dtype=jnp.bfloat16))
    out_b = jax.block_until_ready(fwd_bf16(x_b, map_b, l1_b))
    assert out_b.shape == (Bb_, Sb_, Db_)
    # Compare against a reference built from the same bf16-rounded tables the kernel
    # consumes; remaining error is bf16 rounding of probs / output (< ~1.5e-2 worst case).
    ref_b = map_embedding_ref(x_b,
                              map_b.astype(jnp.bfloat16).astype(jnp.float32),
                              l1_b.astype(jnp.bfloat16).astype(jnp.float32))
    assert jnp.allclose(out_b.astype(jnp.float32), ref_b, atol=3e-2, rtol=3e-2), \
        "bf16 path mismatch"

    print("KERNEL_OK")
</pallas_src>

<mosaic_0001>
module attributes {stable_mosaic.version = 11 : i64} {
  func.func @_map_embedding_kernel(%arg0: i32, %arg1: i32, %arg2: memref<16x1xi32, #tpu.memory_space<vmem>>, %arg3: memref<16x8xf32, #tpu.memory_space<vmem>>, %arg4: memref<8x32xf32, #tpu.memory_space<vmem>>, %arg5: memref<16x32xf32, #tpu.memory_space<vmem>>, %arg6: memref<16x8xf32, #tpu.memory_space<vmem>>) attributes {dimension_semantics = [#tpu.dimension_semantics<parallel>, #tpu.dimension_semantics<arbitrary>], iteration_bounds = array<i64: 1, 1>, scalar_prefetch = 0 : i64, scratch_operands = 1 : i64, tpu.core_type = #tpu.core_type<tc>, window_params = [{transform_indices = @transform_0, window_bounds = array<i64: 16, 1>}, {transform_indices = @transform_1, window_bounds = array<i64: 16, 8>}, {pipeline_mode = #tpu.pipeline_mode<synchronous>, transform_indices = @transform_2, window_bounds = array<i64: 8, 32>}, {transform_indices = @transform_3, window_bounds = array<i64: 16, 32>}]} {
    %c0_i32 = arith.constant 0 : i32
    %0 = arith.cmpi eq, %arg1, %c0_i32 : i32
    %1 = arith.extui %0 : i1 to i32
    %c0_i32_0 = arith.constant 0 : i32
    %2 = arith.cmpi ne, %1, %c0_i32_0 : i32
    scf.if %2 {
      %cst_10 = arith.constant 0.000000e+00 : f32
      %20 = vector.broadcast %cst_10 : f32 to vector<16x8xf32>
      %c0_11 = arith.constant 0 : index
      %c0_12 = arith.constant 0 : index
      %21 = vector.load %arg6[%c0_11, %c0_12] : memref<16x8xf32, #tpu.memory_space<vmem>>, vector<16x8xf32>
      tpu.vector_store %arg6[%c0_11, %c0_12], %20 {strides = array<i32>} : memref<16x8xf32, #tpu.memory_space<vmem>>, vector<16x8xf32>,
    } else {
    }
    %c0 = arith.constant 0 : index
    %c0_1 = arith.constant 0 : index
    %3 = vector.load %arg2[%c0, %c0_1] : memref<16x1xi32, #tpu.memory_space<vmem>>, vector<16x1xi32>
    %4 = tpu.iota {dimensions = array<i32: 1>} : vector<16x16xi32>
    %c16_i32 = arith.constant 16 : i32
    %5 = arith.muli %arg1, %c16_i32 : i32
    %6 = vector.broadcast %5 : i32 to vector<16x16xi32>
    %7 = arith.addi %4, %6 : vector<16x16xi32>
    %8 = vector.broadcast %3 : vector<16x1xi32> to vector<16x16xi32>
    %9 = arith.cmpi eq, %7, %8 : vector<16x16xi32>
    %10 = arith.extui %9 : vector<16x16xi1> to vector<16x16xi32>
    %11 = arith.sitofp %10 : vector<16x16xi32> to vector<16x16xf32>
    %c0_2 = arith.constant 0 : index
    %c0_3 = arith.constant 0 : index
    %12 = vector.load %arg6[%c0_2, %c0_3] : memref<16x8xf32, #tpu.memory_space<vmem>>, vector<16x8xf32>
    %c0_4 = arith.constant 0 : index
    %c0_5 = arith.constant 0 : index
    %13 = vector.load %arg3[%c0_4, %c0_5] : memref<16x8xf32, #tpu.memory_space<vmem>>, vector<16x8xf32>
    %cst = arith.constant dense<0.000000e+00> : vector<16x8xf32>
    %14 = tpu.matmul %11, %13, %cst {dimension_numbers = #tpu.dot_dimension_numbers<[1], [0], [0], [1], [0, 0, 1, 1], [], []>} : vector<16x16xf32>, vector<16x8xf32>, vector<16x8xf32> -> vector<16x8xf32>
    %15 = arith.addf %12, %14 : vector<16x8xf32>
    %c0_6 = arith.constant 0 : index
    %c0_7 = arith.constant 0 : index
    %16 = vector.load %arg6[%c0_6, %c0_7] : memref<16x8xf32, #tpu.memory_space<vmem>>, vector<16x8xf32>
    tpu.vector_store %arg6[%c0_6, %c0_7], %15 {strides = array<i32>} : memref<16x8xf32, #tpu.memory_space<vmem>>, vector<16x8xf32>,
    %c0_i32_8 = arith.constant 0 : i32
    %17 = arith.cmpi eq, %arg1, %c0_i32_8 : i32
    %18 = arith.extui %17 : i1 to i32
    %c0_i32_9 = arith.constant 0 : i32
    %19 = arith.cmpi ne, %18, %c0_i32_9 : i32
    scf.if %19 {
      %c0_10 = arith.constant 0 : index
      %c0_11 = arith.constant 0 : index
      %20 = vector.load %arg6[%c0_10, %c0_11] : memref<16x8xf32, #tpu.memory_space<vmem>>, vector<16x8xf32>
      %cst_12 = arith.constant dense<0xFF800000> : vector<16xf32>
      %21 = vector.multi_reduction <maximumf>, %20, %cst_12 [1] : vector<16x8xf32> to vector<16xf32>
      %22 = vector.shape_cast %21 : vector<16xf32> to vector<16x1xf32>
      %23 = vector.broadcast %22 : vector<16x1xf32> to vector<16x8xf32>
      %24 = arith.subf %20, %23 : vector<16x8xf32>
      %25 = math.exp %24 : vector<16x8xf32>
      %cst_13 = arith.constant dense<0.000000e+00> : vector<16xf32>
      %26 = vector.multi_reduction <add>, %25, %cst_13 [1] : vector<16x8xf32> to vector<16xf32>
      %27 = vector.shape_cast %26 : vector<16xf32> to vector<16x1xf32>
      %28 = vector.broadcast %27 : vector<16x1xf32> to vector<16x8xf32>
      %29 = arith.divf %25, %28 : vector<16x8xf32>
      %c0_14 = arith.constant 0 : index
      %c0_15 = arith.constant 0 : index
      %30 = vector.load %arg4[%c0_14, %c0_15] : memref<8x32xf32, #tpu.memory_space<vmem>>, vector<8x32xf32>
      %cst_16 = arith.constant dense<0.000000e+00> : vector<16x32xf32>
      %31 = tpu.matmul %29, %30, %cst_16 {dimension_numbers = #tpu.dot_dimension_numbers<[1], [0], [0], [1], [0, 0, 1, 1], [], []>} : vector<16x8xf32>, vector<8x32xf32>, vector<16x32xf32> -> vector<16x32xf32>
      %c0_17 = arith.constant 0 : index
      %c0_18 = arith.constant 0 : index
      %32 = vector.load %arg5[%c0_17, %c0_18] : memref<16x32xf32, #tpu.memory_space<vmem>>, vector<16x32xf32>
      tpu.vector_store %arg5[%c0_17, %c0_18], %31 {strides = array<i32>} : memref<16x32xf32, #tpu.memory_space<vmem>>, vector<16x32xf32>,
    } else {
    }
    return
  }
  func.func @transform_0(%arg0: i32, %arg1: i32) -> (i32, i32) {
    %c0_i32 = arith.constant 0 : i32
    %c0_i32_0 = arith.constant 0 : i32
    return %arg0, %c0_i32 : i32, i32
  }
  func.func @transform_1(%arg0: i32, %arg1: i32) -> (i32, i32) {
    %c0_i32 = arith.constant 0 : i32
    %c0_i32_0 = arith.constant 0 : i32
    return %arg1, %c0_i32 : i32, i32
  }
  func.func @transform_2(%arg0: i32, %arg1: i32) -> (i32, i32) {
    %c0_i32 = arith.constant 0 : i32
    %c0_i32_0 = arith.constant 0 : i32
    %c0_i32_1 = arith.constant 0 : i32
    return %c0_i32, %c0_i32_0 : i32, i32
  }
  func.func @transform_3(%arg0: i32, %arg1: i32) -> (i32, i32) {
    %c0_i32 = arith.constant 0 : i32
    %c0_i32_0 = arith.constant 0 : i32
    return %arg0, %c0_i32 : i32, i32
  }
}

</mosaic_0001>

<bundles_post_ra>
// kernel: map_embedding_forward.1
= control target key start
LH: loop header
LB: loop body
LE: loop exit
PB: predicated region body
PF: predicated region fallthrough
CT: control target
= control target key end

     0   :  { %v233_v2 = vmov 0   ;;  %s286_s0 = inlined_call_operand.vmem [shape: s32[16,1], index: 0, kind: input, shape index: {}]   ;;  %s287_s1 = inlined_call_operand.vmem [shape: f32[16,8], index: 1, kind: input, shape index: {}]   ;;  %s288_s2 = inlined_call_operand.vmem [shape: f32[8,32], index: 2, kind: input, shape index: {}]   ;;  %s289_s3 = inlined_call_operand.hbm [shape: f32[16,32], index: 3, kind: output, shape index: {}]  }
   0x1   :  { %v23_v0 = vld [vmem:[%s286_s0 + $0x8] sm:$0xff]  ;;  %198 = vset.pattern.permute.xlu0 %v233_v2 }
   0x2   :  { %v44_v1 = vld [vmem:[%s287_s1 + $0x8] sm:$0xff] }
   0x3   :  { %190 = vmatpush.msra.mxu2 %v44_v1 }
   0x4   :  { %8 = vsyncpa [#allocation4], 0  ;;  %33 = vperm.xlu0 %198, %v23_v0   ;;  %66 = vmatpush.msra.mxu0 %v44_v1  ;;  %v22_v3 = vld [vmem:[%s286_s0] sm:$0xff]  ;;  %vm19_vm0 = vcmask 64512   ;;  %v234_v5 = vmov 0.0   ;;  %v24_v6 = vlaneseq  ;;  %vm45_vm1 = vcmask 130048  }
   0x5   :  { %v43_v4 = vld [vmem:[%s287_s1] sm:$0xff]  ;;  %21 = vst.msk [vmem:[#allocation2 + $0x8] sm:$0xff] %vm19_vm0, %v234_v5  ;;  %s172_s23 = sshll.u32 %s289_s3, 4  ;;  %vm163_vm12 = vcmask 261120   ;;  %s236_s24 = smov 128   ;;  %s173_s23 = int_to_ptr.hbm [resolvable:$true] %s172_s23 }
   0x6   :  { %191 = vmatpush.msra.mxu2 %v43_v4  ;;  %67 = vmatpush.msra.mxu0 %v43_v4  ;;  %20 = vst.msk [vmem:[#allocation2] sm:$0xff] %vm19_vm0, %v234_v5  ;;  %v25_v7 = vand.u32 127, %v24_v6  ;;  %v133_v32 = vld [vmem:[%s288_s2] sm:$0xff]  ;;  %s235_s2 = smov [#allocation3]   ;;  %s237_s25 = smov 8  }
   0x7   :  { %192 = vmatpush.msra.mxu3 %v133_v32  ;;  %155 = vmatpush.msra.mxu1 %v133_v32  ;;  %s170_s20 = sshll.u32 %s235_s2, 4  ;;  %s171_s20 = int_to_ptr.vmem [resolvable:$true] %s170_s20 }
   0xc   :  { %30 = vperm.xlu0 %198, %v22_v3   ;;  %v42_v12 = vld [vmem:[#allocation2 + $0x8] sm:$0xff] }
   0xd   :  { %v41_v14 = vld [vmem:[#allocation2] sm:$0xff] }
  0x76   :  { %v34_v8 = vpop.permute.xlu0 %33 }
  0x77   :  { %vm36_vm2 = vcmp.eq.s32.totalorder %v25_v7, %v34_v8 }
  0x78   :  { %v185_v9 = vsel %vm36_vm2, 1.0, %v234_v5 }
  0x79   :  { %187 = vmatmul.msk.f32.vlgmr.msra.gmra.mxu2 %vm45_vm1, %v185_v9 }
  0x7e   :  { %v31_v10 = vpop.permute.xlu0 %30 }
  0x7f   :  { %vm35_vm3 = vcmp.eq.s32.totalorder %v25_v7, %v31_v10 }
  0x80   :  { %v184_v11 = vsel %vm35_vm3, 1.0, %v234_v5 }
  0x81   :  { %186 = vmatmul.msk.f32.vlgmr.msra.gmra.mxu0 %vm45_vm1, %v184_v11 }
  0xfc   :  { %v72_v13 = vpop.f32.mrf.mxu2 }
  0xfd   :  { %v76_v15 = vadd.f32 %v72_v13, %v42_v12 }
  0xfe   :  { %v69_v16 = vpop.f32.mrf.mxu0 }
  0xff   :  { %79 = vst.msk [vmem:[#allocation2 + $0x8] sm:$0xff] %vm19_vm0, %v76_v15  ;;  %v75_v17 = vadd.f32 %v69_v16, %v41_v14 }
 0x101   :  { %78 = vst.msk [vmem:[#allocation2] sm:$0xff] %vm19_vm0, %v75_v17 }
 0x106   :  { %v84_v18 = vld [vmem:[#allocation2 + $0x8] sm:$0xff] }
 0x107   :  { %v88_v19 = vsel %vm19_vm0, %v84_v18, -inf }
 0x108   :  { %89 = vmax.xlane.f32.xlu1 %v88_v19  ;;  %v83_v20 = vld [vmem:[#allocation2] sm:$0xff] }
 0x109   :  { %v85_v21 = vsel %vm19_vm0, %v83_v20, -inf }
 0x110   :  { %86 = vmax.xlane.f32.xlu1 %v85_v21 }
 0x17b   :  { %v90_v22 = vpop.xlane.xlu1 %89 }
 0x17c   :  { %v92_v23 = vsub.f32 %v84_v18, %v90_v22 }
 0x17e   :  { %v95_v24 = vmul.f32 1.442695, %v92_v23 }
 0x180   :  { %199 = vpow2.f32 %v95_v24 }
 0x183   :  { %v87_v25 = vpop.xlane.xlu1 %86 }
 0x184   :  { %v91_v26 = vsub.f32 %v83_v20, %v87_v25 }
 0x186   :  { %v200_v27 = vpop.eup %199  ;;  %v93_v28 = vmul.f32 1.442695, %v91_v26 }
 0x187   :  { %v100_v29 = vsel %vm19_vm0, %v200_v27, 0.0 }
 0x188   :  { %201 = vpow2.f32 %v93_v28  ;;  %101 = vadd.xlane.f32.xlu2 %v100_v29 }
 0x18e   :  { %v202_v30 = vpop.eup %201 }
 0x18f   :  { %v97_v31 = vsel %vm19_vm0, %v202_v30, 0.0 }
 0x190   :  { %98 = vadd.xlane.f32.xlu2 %v97_v31 }
 0x1fb   :  { %v102_v33 = vpop.xlane.xlu2 %101 }
 0x1fc   :  { %203 = vrcp.f32 %v102_v33  ;;  %v129_v38 = vand.u32 2147483648, %v102_v33  ;;  %v127_v40 = vand.u32 2147483647, %v102_v33  ;;  %vm123_vm5 = vweird.f32 %v102_v33 }
 0x1fe   :  { %v130_v43 = vor.u32 1.1754944e-38, %v129_v38  ;;  %vm128_vm7 = vcmp.eq.f32.partialorder %v127_v40, 8.507059e+37 }
 0x202   :  { %v204_v34 = vpop.eup %203 }
 0x203   :  { %v119_v35 = vmul.f32 %v204_v34, %v102_v33  ;;  %v99_v36 = vpop.xlane.xlu2 %98  ;;  %vm124_vm4 = vweird.f32 %v204_v34 }
 0x204   :  { %205 = vrcp.f32 %v99_v36  ;;  %vm125_vm6 = vmor %vm123_vm5, %vm124_vm4  ;;  %v114_v49 = vand.u32 2147483648, %v99_v36  ;;  %v112_v51 = vand.u32 2147483647, %v99_v36  ;;  %vm108_vm9 = vweird.f32 %v99_v36 }
 0x205   :  { %v120_v37 = vsub.f32 1.0, %v119_v35 }
 0x206   :  { %v115_v53 = vor.u32 1.1754944e-38, %v114_v49  ;;  %vm113_vm11 = vcmp.eq.f32.partialorder %v112_v51, 8.507059e+37 }
 0x207   :  { %v121_v39 = vmul.f32 %v204_v34, %v120_v37 }
 0x209   :  { %v122_v41 = vadd.f32 %v204_v34, %v121_v39 }
 0x20a   :  { %v206_v42 = vpop.eup %205 }
 0x20b   :  { %v104_v44 = vmul.f32 %v206_v42, %v99_v36  ;;  %v126_v45 = vsel %vm125_vm6, %v204_v34, %v122_v41  ;;  %vm109_vm8 = vweird.f32 %v206_v42 }
 0x20c   :  { %v131_v46 = vsel %vm128_vm7, %v130_v43, %v126_v45  ;;  %vm110_vm10 = vmor %vm108_vm9, %vm109_vm8 }
 0x20d   :  { %v105_v47 = vsub.f32 1.0, %v104_v44  ;;  %v132_v48 = vmul.f32 %v200_v27, %v131_v46 }
 0x20f   :  { %v106_v50 = vmul.f32 %v206_v42, %v105_v47  ;;  %189 = vmatmul.msk.f32.vlgmr.msra.gmra.mxu3 %vm19_vm0, %v132_v48 }
 0x211   :  { %v107_v52 = vadd.f32 %v206_v42, %v106_v50 }
 0x213   :  { %v111_v54 = vsel %vm110_vm10, %v206_v42, %v107_v52 }
 0x214   :  { %v116_v55 = vsel %vm113_vm11, %v115_v53, %v111_v54 }
 0x215   :  { %v117_v56 = vmul.f32 %v202_v30, %v116_v55 }
 0x217   :  { %188 = vmatmul.msk.f32.vlgmr.msra.gmra.mxu1 %vm19_vm0, %v117_v56 }
 0x292   :  { %v160_v57 = vpop.f32.mrf.mxu3 }
 0x293   :  { %165 = vst.msk [vmem:[#allocation3 + $0x8] sm:$0xff] %vm163_vm12, %v160_v57 }
 0x294   :  { %v157_v58 = vpop.f32.mrf.mxu1 }
 0x295   :  { %164 = vst.msk [vmem:[#allocation3] sm:$0xff] %vm163_vm12, %v157_v58 }
 0x296   :  { %178 = dma.vmem_to_hbm [thread:$0]  %s171_s20, 256, %s173_s23, [#allocation4], %s236_s24, %s236_s24, %s237_s25  }
 0x297   :  { %231 = dma.done.wait [#allocation4], 256  }
 0x298   :  { %232 = vsyncadd [#allocation4], 4294967040 }
 0x299   :  { %183 = vsyncpa [#allocation4], 1 }

</bundles_post_ra>
